<compile_context>
chip_gen: v7x
topology: tpu7x:2x2x1
jax: 0.10.0
libtpu: 0.0.40
codegen_flags: <defaults>
</compile_context>

<pallas_src>
import jax
import jax.numpy as jnp
from jax.experimental import pallas as pl
from jax.experimental.pallas import tpu as pltpu


def _dueling_mlp_kernel(
    x_ref,
    w1_ref, b1_ref,
    w2_ref, b2_ref,
    w3_ref, b3_ref,
    w4_ref, b4_ref,
    wh_ref, bh_ref,
    out_ref,
):
    def layer(h_bf16, w_ref, b_ref):
        # bf16 MXU operands, f32 accumulation + bias + ReLU.
        y = jnp.dot(h_bf16, w_ref[...], preferred_element_type=jnp.float32)
        y = jnp.maximum(y + b_ref[...], 0.0)
        return y.astype(jnp.bfloat16)

    h = x_ref[...].astype(jnp.bfloat16)
    h = layer(h, w1_ref, b1_ref)
    h = layer(h, w2_ref, b2_ref)
    h = layer(h, w3_ref, b3_ref)
    h = layer(h, w4_ref, b4_ref)
    # Folded dueling head: out = h4 @ W_head + b_head   (f32 output, no ReLU)
    out_ref[...] = (
        jnp.dot(h, wh_ref[...], preferred_element_type=jnp.float32) + bh_ref[...]
    )


def _round_up(n, m):
    return ((n + m - 1) // m) * m


def dueling_mlp(x, params, *, tile_b=512):
    """x: [B, num_states] f32. params: flat tuple of (w, b) pairs for 6 layers."""
    w1, b1, w2, b2, w3, b3, w4, b4, wa, ba, wv, bv = params
    num_actions = wa.shape[1]

    # ---- fold the dueling head into one matmul (recomputed per call) -------
    w_head = wa + wv - jnp.mean(wa, axis=1, keepdims=True)   # [256, A]
    b_head = ba + bv - jnp.mean(ba)                          # [1, A]

    # ---- lane-pad head output to a multiple of 128 (unmasked stores) -------
    a_pad = _round_up(num_actions, 128)
    w_head = jnp.pad(w_head, ((0, 0), (0, a_pad - num_actions)))
    b_head = jnp.pad(b_head, ((0, 0), (0, a_pad - num_actions)))

    # ---- bf16 matmul operands, f32 biases -----------------------------------
    weights = [w.astype(jnp.bfloat16) for w in (w1, w2, w3, w4, w_head)]
    biases = [b.astype(jnp.float32) for b in (b1, b2, b3, b4, b_head)]

    # ---- batch tiling --------------------------------------------------------
    batch, num_states = x.shape
    tile = min(tile_b, _round_up(batch, 8))     # sublane-aligned, v7x-VMEM-safe
    b_pad = _round_up(batch, tile)
    if b_pad != batch:
        x = jnp.pad(x, ((0, b_pad - batch), (0, 0)))
    x = x.astype(jnp.bfloat16)                  # halves x DMA; matmul dtype anyway
    grid = (b_pad // tile,)

    const_map = lambda i: (0, 0)                # weights stay resident in VMEM
    param_specs = []
    for w, b in zip(weights, biases):
        param_specs.append(pl.BlockSpec(w.shape, const_map))
        param_specs.append(pl.BlockSpec(b.shape, const_map))
    param_args = [p for pair in zip(weights, biases) for p in pair]

    out = pl.pallas_call(
        _dueling_mlp_kernel,
        out_shape=jax.ShapeDtypeStruct((b_pad, a_pad), jnp.float32),
        grid=grid,
        in_specs=[pl.BlockSpec((tile, num_states), lambda i: (i, 0))] + param_specs,
        out_specs=pl.BlockSpec((tile, a_pad), lambda i: (i, 0)),
        compiler_params=pltpu.CompilerParams(
            dimension_semantics=("parallel",),
            vmem_limit_bytes=32 * 1024 * 1024,
        ),
    )(x, *param_args)

    return out[:batch, :num_actions]


def init_params(key, num_states, num_actions):
    """Deterministic init mirroring torch.nn.Linear defaults:
    U(-1/sqrt(fan_in), 1/sqrt(fan_in)) for both weight and bias.
    Weights stored transposed as [in, out]; biases as [1, out]."""
    dims = [
        (num_states, 16),    # fc1
        (16, 64),            # fc2
        (64, 256),           # fc3
        (256, 256),          # fc4
        (256, num_actions),  # fc5_adv
        (256, 1),            # fc5_v
    ]
    params = []
    for (fan_in, fan_out) in dims:
        key, kw, kb = jax.random.split(key, 3)
        bound = 1.0 / (fan_in ** 0.5)
        w = jax.random.uniform(kw, (fan_in, fan_out), jnp.float32, -bound, bound)
        b = jax.random.uniform(kb, (1, fan_out), jnp.float32, -bound, bound)
        params.extend([w, b])
    return tuple(params)


def reference_forward(x, params):
    """Pure-JAX f32 reference of the PyTorch forward for a sanity check."""
    w1, b1, w2, b2, w3, b3, w4, b4, wa, ba, wv, bv = params
    h = jnp.maximum(x @ w1 + b1, 0.0)
    h = jnp.maximum(h @ w2 + b2, 0.0)
    h = jnp.maximum(h @ w3 + b3, 0.0)
    h = jnp.maximum(h @ w4 + b4, 0.0)
    adv = h @ wa + ba
    val = h @ wv + bv
    return val + adv - jnp.mean(adv, axis=1, keepdims=True)


if __name__ == "__main__":
    num_states = 4     # e.g. pendulum-like state vector
    num_actions = 4    # discretized action space
    batch = 8

    key = jax.random.PRNGKey(0)
    key, kx = jax.random.split(key)
    x = jax.random.normal(kx, (batch, num_states), jnp.float32)
    params = init_params(key, num_states, num_actions)

    out = dueling_mlp(x, params)
    out = jax.block_until_ready(out)

    ref = reference_forward(x, params)
    assert out.shape == (batch, num_actions)
    # Kernel uses bf16 MXU operands; compare against the f32 reference with a
    # correspondingly loosened (but still meaningful) tolerance.
    assert jnp.allclose(out, ref, atol=2e-2, rtol=2e-2), "mismatch vs reference"

    print("KERNEL_OK")
</pallas_src>

<mosaic_0001>
module attributes {stable_mosaic.version = 11 : i64} {
  func.func @_dueling_mlp_kernel(%arg0: i32, %arg1: memref<8x4xbf16, #tpu.memory_space<vmem>>, %arg2: memref<4x16xbf16, #tpu.memory_space<vmem>>, %arg3: memref<1x16xf32, #tpu.memory_space<vmem>>, %arg4: memref<16x64xbf16, #tpu.memory_space<vmem>>, %arg5: memref<1x64xf32, #tpu.memory_space<vmem>>, %arg6: memref<64x256xbf16, #tpu.memory_space<vmem>>, %arg7: memref<1x256xf32, #tpu.memory_space<vmem>>, %arg8: memref<256x256xbf16, #tpu.memory_space<vmem>>, %arg9: memref<1x256xf32, #tpu.memory_space<vmem>>, %arg10: memref<256x128xbf16, #tpu.memory_space<vmem>>, %arg11: memref<1x128xf32, #tpu.memory_space<vmem>>, %arg12: memref<8x128xf32, #tpu.memory_space<vmem>>) attributes {dimension_semantics = [#tpu.dimension_semantics<parallel>], iteration_bounds = array<i64: 1>, scalar_prefetch = 0 : i64, scratch_operands = 0 : i64, tpu.core_type = #tpu.core_type<tc>, window_params = [{transform_indices = @transform_0, window_bounds = array<i64: 8, 4>}, {pipeline_mode = #tpu.pipeline_mode<synchronous>, transform_indices = @transform_1, window_bounds = array<i64: 4, 16>}, {pipeline_mode = #tpu.pipeline_mode<synchronous>, transform_indices = @transform_2, window_bounds = array<i64: 1, 16>}, {pipeline_mode = #tpu.pipeline_mode<synchronous>, transform_indices = @transform_3, window_bounds = array<i64: 16, 64>}, {pipeline_mode = #tpu.pipeline_mode<synchronous>, transform_indices = @transform_4, window_bounds = array<i64: 1, 64>}, {pipeline_mode = #tpu.pipeline_mode<synchronous>, transform_indices = @transform_5, window_bounds = array<i64: 64, 256>}, {pipeline_mode = #tpu.pipeline_mode<synchronous>, transform_indices = @transform_6, window_bounds = array<i64: 1, 256>}, {pipeline_mode = #tpu.pipeline_mode<synchronous>, transform_indices = @transform_7, window_bounds = array<i64: 256, 256>}, {pipeline_mode = #tpu.pipeline_mode<synchronous>, transform_indices = @transform_8, window_bounds = array<i64: 1, 256>}, {pipeline_mode = #tpu.pipeline_mode<synchronous>, transform_indices = @transform_9, window_bounds = array<i64: 256, 128>}, {pipeline_mode = #tpu.pipeline_mode<synchronous>, transform_indices = @transform_10, window_bounds = array<i64: 1, 128>}, {transform_indices = @transform_11, window_bounds = array<i64: 8, 128>}]} {
    %c0 = arith.constant 0 : index
    %c0_0 = arith.constant 0 : index
    %0 = vector.load %arg1[%c0, %c0_0] : memref<8x4xbf16, #tpu.memory_space<vmem>>, vector<8x4xbf16>
    %c0_1 = arith.constant 0 : index
    %c0_2 = arith.constant 0 : index
    %1 = vector.load %arg2[%c0_1, %c0_2] : memref<4x16xbf16, #tpu.memory_space<vmem>>, vector<4x16xbf16>
    %cst = arith.constant dense<0.000000e+00> : vector<8x16xf32>
    %2 = tpu.matmul %0, %1, %cst {dimension_numbers = #tpu.dot_dimension_numbers<[1], [0], [0], [1], [0, 0, 1, 1], [], []>} : vector<8x4xbf16>, vector<4x16xbf16>, vector<8x16xf32> -> vector<8x16xf32>
    %c0_3 = arith.constant 0 : index
    %c0_4 = arith.constant 0 : index
    %3 = vector.load %arg3[%c0_3, %c0_4] : memref<1x16xf32, #tpu.memory_space<vmem>>, vector<1x16xf32>
    %4 = vector.broadcast %3 : vector<1x16xf32> to vector<8x16xf32>
    %5 = arith.addf %2, %4 : vector<8x16xf32>
    %cst_5 = arith.constant 0.000000e+00 : f32
    %6 = vector.broadcast %cst_5 : f32 to vector<8x16xf32>
    %7 = arith.maximumf %5, %6 : vector<8x16xf32>
    %8 = arith.truncf %7 : vector<8x16xf32> to vector<8x16xbf16>
    %c0_6 = arith.constant 0 : index
    %c0_7 = arith.constant 0 : index
    %9 = vector.load %arg4[%c0_6, %c0_7] : memref<16x64xbf16, #tpu.memory_space<vmem>>, vector<16x64xbf16>
    %cst_8 = arith.constant dense<0.000000e+00> : vector<8x64xf32>
    %10 = tpu.matmul %8, %9, %cst_8 {dimension_numbers = #tpu.dot_dimension_numbers<[1], [0], [0], [1], [0, 0, 1, 1], [], []>} : vector<8x16xbf16>, vector<16x64xbf16>, vector<8x64xf32> -> vector<8x64xf32>
    %c0_9 = arith.constant 0 : index
    %c0_10 = arith.constant 0 : index
    %11 = vector.load %arg5[%c0_9, %c0_10] : memref<1x64xf32, #tpu.memory_space<vmem>>, vector<1x64xf32>
    %12 = vector.broadcast %11 : vector<1x64xf32> to vector<8x64xf32>
    %13 = arith.addf %10, %12 : vector<8x64xf32>
    %cst_11 = arith.constant 0.000000e+00 : f32
    %14 = vector.broadcast %cst_11 : f32 to vector<8x64xf32>
    %15 = arith.maximumf %13, %14 : vector<8x64xf32>
    %16 = arith.truncf %15 : vector<8x64xf32> to vector<8x64xbf16>
    %c0_12 = arith.constant 0 : index
    %c0_13 = arith.constant 0 : index
    %17 = vector.load %arg6[%c0_12, %c0_13] : memref<64x256xbf16, #tpu.memory_space<vmem>>, vector<64x256xbf16>
    %cst_14 = arith.constant dense<0.000000e+00> : vector<8x256xf32>
    %18 = tpu.matmul %16, %17, %cst_14 {dimension_numbers = #tpu.dot_dimension_numbers<[1], [0], [0], [1], [0, 0, 1, 1], [], []>} : vector<8x64xbf16>, vector<64x256xbf16>, vector<8x256xf32> -> vector<8x256xf32>
    %c0_15 = arith.constant 0 : index
    %c0_16 = arith.constant 0 : index
    %19 = vector.load %arg7[%c0_15, %c0_16] : memref<1x256xf32, #tpu.memory_space<vmem>>, vector<1x256xf32>
    %20 = vector.broadcast %19 : vector<1x256xf32> to vector<8x256xf32>
    %21 = arith.addf %18, %20 : vector<8x256xf32>
    %cst_17 = arith.constant 0.000000e+00 : f32
    %22 = vector.broadcast %cst_17 : f32 to vector<8x256xf32>
    %23 = arith.maximumf %21, %22 : vector<8x256xf32>
    %24 = arith.truncf %23 : vector<8x256xf32> to vector<8x256xbf16>
    %c0_18 = arith.constant 0 : index
    %c0_19 = arith.constant 0 : index
    %25 = vector.load %arg8[%c0_18, %c0_19] : memref<256x256xbf16, #tpu.memory_space<vmem>>, vector<256x256xbf16>
    %cst_20 = arith.constant dense<0.000000e+00> : vector<8x256xf32>
    %26 = tpu.matmul %24, %25, %cst_20 {dimension_numbers = #tpu.dot_dimension_numbers<[1], [0], [0], [1], [0, 0, 1, 1], [], []>} : vector<8x256xbf16>, vector<256x256xbf16>, vector<8x256xf32> -> vector<8x256xf32>
    %c0_21 = arith.constant 0 : index
    %c0_22 = arith.constant 0 : index
    %27 = vector.load %arg9[%c0_21, %c0_22] : memref<1x256xf32, #tpu.memory_space<vmem>>, vector<1x256xf32>
    %28 = vector.broadcast %27 : vector<1x256xf32> to vector<8x256xf32>
    %29 = arith.addf %26, %28 : vector<8x256xf32>
    %cst_23 = arith.constant 0.000000e+00 : f32
    %30 = vector.broadcast %cst_23 : f32 to vector<8x256xf32>
    %31 = arith.maximumf %29, %30 : vector<8x256xf32>
    %32 = arith.truncf %31 : vector<8x256xf32> to vector<8x256xbf16>
    %c0_24 = arith.constant 0 : index
    %c0_25 = arith.constant 0 : index
    %33 = vector.load %arg10[%c0_24, %c0_25] : memref<256x128xbf16, #tpu.memory_space<vmem>>, vector<256x128xbf16>
    %cst_26 = arith.constant dense<0.000000e+00> : vector<8x128xf32>
    %34 = tpu.matmul %32, %33, %cst_26 {dimension_numbers = #tpu.dot_dimension_numbers<[1], [0], [0], [1], [0, 0, 1, 1], [], []>} : vector<8x256xbf16>, vector<256x128xbf16>, vector<8x128xf32> -> vector<8x128xf32>
    %c0_27 = arith.constant 0 : index
    %c0_28 = arith.constant 0 : index
    %35 = vector.load %arg11[%c0_27, %c0_28] : memref<1x128xf32, #tpu.memory_space<vmem>>, vector<1x128xf32>
    %36 = vector.broadcast %35 : vector<1x128xf32> to vector<8x128xf32>
    %37 = arith.addf %34, %36 : vector<8x128xf32>
    %c0_29 = arith.constant 0 : index
    %c0_30 = arith.constant 0 : index
    %38 = vector.load %arg12[%c0_29, %c0_30] : memref<8x128xf32, #tpu.memory_space<vmem>>, vector<8x128xf32>
    tpu.vector_store %arg12[%c0_29, %c0_30], %37 {strides = array<i32>} : memref<8x128xf32, #tpu.memory_space<vmem>>, vector<8x128xf32>,
    return
  }
  func.func @transform_0(%arg0: i32) -> (i32, i32) {
    %c0_i32 = arith.constant 0 : i32
    %c0_i32_0 = arith.constant 0 : i32
    return %arg0, %c0_i32 : i32, i32
  }
  func.func @transform_1(%arg0: i32) -> (i32, i32) {
    %c0_i32 = arith.constant 0 : i32
    %c0_i32_0 = arith.constant 0 : i32
    %c0_i32_1 = arith.constant 0 : i32
    return %c0_i32, %c0_i32_0 : i32, i32
  }
  func.func @transform_2(%arg0: i32) -> (i32, i32) {
    %c0_i32 = arith.constant 0 : i32
    %c0_i32_0 = arith.constant 0 : i32
    %c0_i32_1 = arith.constant 0 : i32
    return %c0_i32, %c0_i32_0 : i32, i32
  }
  func.func @transform_3(%arg0: i32) -> (i32, i32) {
    %c0_i32 = arith.constant 0 : i32
    %c0_i32_0 = arith.constant 0 : i32
    %c0_i32_1 = arith.constant 0 : i32
    return %c0_i32, %c0_i32_0 : i32, i32
  }
  func.func @transform_4(%arg0: i32) -> (i32, i32) {
    %c0_i32 = arith.constant 0 : i32
    %c0_i32_0 = arith.constant 0 : i32
    %c0_i32_1 = arith.constant 0 : i32
    return %c0_i32, %c0_i32_0 : i32, i32
  }
  func.func @transform_5(%arg0: i32) -> (i32, i32) {
    %c0_i32 = arith.constant 0 : i32
    %c0_i32_0 = arith.constant 0 : i32
    %c0_i32_1 = arith.constant 0 : i32
    return %c0_i32, %c0_i32_0 : i32, i32
  }
  func.func @transform_6(%arg0: i32) -> (i32, i32) {
    %c0_i32 = arith.constant 0 : i32
    %c0_i32_0 = arith.constant 0 : i32
    %c0_i32_1 = arith.constant 0 : i32
    return %c0_i32, %c0_i32_0 : i32, i32
  }
  func.func @transform_7(%arg0: i32) -> (i32, i32) {
    %c0_i32 = arith.constant 0 : i32
    %c0_i32_0 = arith.constant 0 : i32
    %c0_i32_1 = arith.constant 0 : i32
    return %c0_i32, %c0_i32_0 : i32, i32
  }
  func.func @transform_8(%arg0: i32) -> (i32, i32) {
    %c0_i32 = arith.constant 0 : i32
    %c0_i32_0 = arith.constant 0 : i32
    %c0_i32_1 = arith.constant 0 : i32
    return %c0_i32, %c0_i32_0 : i32, i32
  }
  func.func @transform_9(%arg0: i32) -> (i32, i32) {
    %c0_i32 = arith.constant 0 : i32
    %c0_i32_0 = arith.constant 0 : i32
    %c0_i32_1 = arith.constant 0 : i32
    return %c0_i32, %c0_i32_0 : i32, i32
  }
  func.func @transform_10(%arg0: i32) -> (i32, i32) {
    %c0_i32 = arith.constant 0 : i32
    %c0_i32_0 = arith.constant 0 : i32
    %c0_i32_1 = arith.constant 0 : i32
    return %c0_i32, %c0_i32_0 : i32, i32
  }
  func.func @transform_11(%arg0: i32) -> (i32, i32) {
    %c0_i32 = arith.constant 0 : i32
    %c0_i32_0 = arith.constant 0 : i32
    return %arg0, %c0_i32 : i32, i32
  }
}

</mosaic_0001>

<bundles_post_ra>
// kernel: tpu_custom_call.1
= control target key start
LH: loop header
LB: loop body
LE: loop exit
PB: predicated region body
PF: predicated region fallthrough
CT: control target
= control target key end

     0   :  { %16 = vsyncpa [#allocation3], 0  ;;  %s1184_s0 = inlined_call_operand.vmem [shape: bf16[8,4], index: 0, kind: input, shape index: {}]   ;;  %s1185_s1 = inlined_call_operand.vmem [shape: bf16[4,16], index: 1, kind: input, shape index: {}]   ;;  %s1186_s2 = inlined_call_operand.vmem [shape: f32[1,16], index: 2, kind: input, shape index: {}]   ;;  %s1187_s3 = inlined_call_operand.vmem [shape: bf16[16,64], index: 3, kind: input, shape index: {}]   ;;  %s1188_s4 = inlined_call_operand.vmem [shape: f32[1,64], index: 4, kind: input, shape index: {}]   ;;  %s1189_s5 = inlined_call_operand.hbm [shape: bf16[64,256], index: 5, kind: input, shape index: {}]   ;;  %s1190_s6 = inlined_call_operand.vmem [shape: f32[1,256], index: 6, kind: input, shape index: {}]   ;;  %s1191_s7 = inlined_call_operand.hbm [shape: bf16[256,256], index: 7, kind: input, shape index: {}]   ;;  %s1192_s8 = inlined_call_operand.vmem [shape: f32[1,256], index: 8, kind: input, shape index: {}]   ;;  %s1193_s9 = inlined_call_operand.hbm [shape: bf16[256,128], index: 9, kind: input, shape index: {}]   ;;  %s1194_s10 = inlined_call_operand.vmem [shape: f32[1,128], index: 10, kind: input, shape index: {}]   ;;  %s1195_s11 = inlined_call_operand.hbm [shape: f32[8,128], index: 11, kind: output, shape index: {}]  }
   0x1   :  { %17 = vsyncpa [#allocation6], 0 }
   0x2   :  { %18 = vsyncpa [#allocation4], 0  ;;  %s1034_s17 = smov [#allocation5]   ;;  %s1035_s19 = smov [#allocation2]  }
   0x3   :  { %s48_s18 = sshll.u32 %s1034_s17, 4  ;;  %s34_s20 = sshll.u32 %s1035_s19, 4  ;;  %s49_s18 = int_to_ptr.vmem [resolvable:$true] %s48_s18  ;;  %s1105_s20 = int_to_ptr.vmem [resolvable:$true] %s34_s20 }
   0x4   :  { %s940_s23 = scalar_lea.hbm %s1191_s7, 4096 }
   0x5   :  { %p941_p0 = scmp.ne.s32.totalorder %s1191_s7, %s940_s23  ;;  %p944_p1 = scmp.lt.u32.totalorder %s940_s23, %s1191_s7 }
   0x7   :  { %p946_p2 = pnand %p944_p1, %p941_p0 }
   0x9   :  { %949 = shalt.err (!%p946_p2)
}
   0xa   :  { %s950_s28 = scalar_lea.vmem %s49_s18, 4096  ;;  %p955_p4 = scmp.lt.s32.totalorder %s49_s18, %s49_s18 }
   0xb   :  { %p951_p3 = scmp.ne.s32.totalorder %s49_s18, %s950_s28  ;;  %p956_p5 = scmp.lt.s32.totalorder %s950_s28, %s950_s28 }
   0xd   :  { %p957_p6 = por %p956_p5, %p955_p4 }
   0xf   :  { %p958_p7 = pnand %p957_p6, %p951_p3 }
  0x11   :  { %961 = shalt.err (!%p958_p7)
}
  0x12   :  { %s1036_s29 = smov 128   ;;  %s1037_s30 = smov 8  }
  0x13   :  { %54 = dma.hbm_to_vmem [thread:$0]  %s1191_s7, 4096, %s49_s18, [#allocation6], %s1036_s29, %s1036_s29, %s1037_s30  }
  0x14   :  { %s962_s16 = scalar_lea.hbm %s1189_s5, 1024 }
  0x15   :  { %p963_p8 = scmp.ne.s32.totalorder %s1189_s5, %s962_s16  ;;  %p966_p9 = scmp.lt.u32.totalorder %s962_s16, %s1189_s5 }
  0x17   :  { %p968_p10 = pnand %p966_p9, %p963_p8 }
  0x19   :  { %971 = shalt.err (!%p968_p10)
}
  0x1a   :  { %s972_s23 = scalar_lea.vmem %s1105_s20, 1024  ;;  %p977_p12 = scmp.lt.s32.totalorder %s1105_s20, %s1105_s20 }
  0x1b   :  { %p973_p11 = scmp.ne.s32.totalorder %s1105_s20, %s972_s23  ;;  %p978_p13 = scmp.lt.s32.totalorder %s972_s23, %s972_s23 }
  0x1d   :  { %p979_p0 = por %p978_p13, %p977_p12 }
  0x1f   :  { %p980_p1 = pnand %p979_p0, %p973_p11 }
  0x21   :  { %983 = shalt.err (!%p980_p1)
}
  0x22   :  { %40 = dma.hbm_to_vmem [thread:$0]  %s1189_s5, 1024, %s1105_s20, [#allocation3], %s1036_s29, %s1036_s29, %s1037_s30  }
  0x23   :  { %s1038_s24 = smov [#allocation7]   ;;  %s984_s28 = scalar_lea.hbm %s1193_s9, 2048 }
  0x24   :  { %s62_s25 = sshll.u32 %s1038_s24, 4  ;;  %p985_p2 = scmp.ne.s32.totalorder %s1193_s9, %s984_s28  ;;  %s63_s25 = int_to_ptr.vmem [resolvable:$true] %s62_s25 }
  0x25   :  { %p988_p3 = scmp.lt.u32.totalorder %s984_s28, %s1193_s9 }
  0x27   :  { %p990_p4 = pnand %p988_p3, %p985_p2 }
  0x29   :  { %993 = shalt.err (!%p990_p4)
}
  0x2a   :  { %s994_s16 = scalar_lea.vmem %s63_s25, 2048  ;;  %p999_p6 = scmp.lt.s32.totalorder %s63_s25, %s63_s25 }
  0x2b   :  { %p995_p5 = scmp.ne.s32.totalorder %s63_s25, %s994_s16  ;;  %p1000_p7 = scmp.lt.s32.totalorder %s994_s16, %s994_s16 }
  0x2d   :  { %p1001_p8 = por %p1000_p7, %p999_p6 }
  0x2f   :  { %p1002_p9 = pnand %p1001_p8, %p995_p5 }
  0x31   :  { %1005 = shalt.err (!%p1002_p9)
}
  0x32   :  { %s1039_s5 = smov 64   ;;  %s1040_s20 = smov 4  }
  0x33   :  { %68 = dma.hbm_to_vmem [thread:$0]  %s1193_s9, 2048, %s63_s25, [#allocation6], %s1039_s5, %s1039_s5, %s1040_s20  }
  0x34   :  { %1028 = dma.done.wait [#allocation3], 1024  }
  0x35   :  { %1029 = vsyncadd [#allocation3], 4294966272 }
  0x36   :  { %1030 = dma.done.wait [#allocation6], 6144  }
  0x37   :  { %1031 = vsyncadd [#allocation6], 4294961152  ;;  %v1041_v0 = vmov 0.0   ;;  %vm1042_vm0 = vmmov 0   ;;  %vm94_vm1 = vcmask 1041408   ;;  %v863_v4 = vld [vmem:[%s1187_s3] sm:$0xff]  }
  0x38   :  { %840 = vmatprep.subr.bf16.mxu0 %v1041_v0  ;;  %842 = vmatprep.mubr.msk.bf16.mxu0 %vm1042_vm0, %v1041_v0  ;;  %v82_v1 = vld [vmem:[%s1185_s1] sm:$0x3]  ;;  %vm90_vm2 = vcmask 31744   ;;  %v866_v5 = vld [vmem:[#allocation2 + $0x4] ss:$8 sps:$4 sm:$0xff]   ;;  %vm155_vm3 = vcmask 130048  }
  0x39   :  { %v96_v2 = vsel %vm94_vm1, %v82_v1, 0  ;;  %v81_v3 = vld [vmem:[%s1184_s0] sm:$0xf]  ;;  %v864_v13 = vld [vmem:[#allocation2] ss:$8 sps:$4 sm:$0xff]   ;;  %v1043_v21 = vmov 0  }
  0x3a   :  { %841 = vmatpush3.bf16.msra.mxu0 %v96_v2  ;;  %v751_v6 = vld [vmem:[%s1186_s2] ss:$0 sm:$0xff]  ;;  %v869_v15 = vld [vmem:[#allocation2 + $0x14] ss:$8 sps:$4 sm:$0xff]   ;;  %v872_v17 = vld [vmem:[#allocation2 + $0x24] ss:$8 sps:$4 sm:$0xff]  }
  0x3b   :  { %846 = vmatprep.subr.bf16.mxu0 %v1041_v0  ;;  %v867_v16 = vld [vmem:[#allocation2 + $0x10] ss:$8 sps:$4 sm:$0xff]   ;;  %v870_v18 = vld [vmem:[#allocation2 + $0x20] ss:$8 sps:$4 sm:$0xff]   ;;  %v875_v19 = vld [vmem:[#allocation2 + $0x34] ss:$8 sps:$4 sm:$0xff]  }
  0x3c   :  { %v873_v20 = vld [vmem:[#allocation2 + $0x30] ss:$8 sps:$4 sm:$0xff]   ;;  %v876_v22 = vld [vmem:[#allocation5 + $0x4] ss:$8 sps:$4 sm:$0xff]   ;;  %v878_v23 = vld [vmem:[#allocation5] ss:$8 sps:$4 sm:$0xff]  }
  0x3d   :  { %843 = vmatmul.mubr.msk.bf16.vlgmr.msra.gmra.mrb[0].mxu0 %vm90_vm2, %v81_v3  ;;  %v879_v24 = vld [vmem:[#allocation5 + $0x14] ss:$8 sps:$4 sm:$0xff]   ;;  %514 = vmatprep.subr.bf16.mxu1 %v876_v22  ;;  %v881_v25 = vld [vmem:[#allocation5 + $0x10] ss:$8 sps:$4 sm:$0xff]   ;;  %v882_v26 = vld [vmem:[#allocation5 + $0x24] ss:$8 sps:$4 sm:$0xff]  }
  0x3e   :  { %847 = vmatpush3.bf16.msra.mxu0 %v863_v4  ;;  %848 = vmatprep.mubr.msk.bf16.mxu0 %vm1042_vm0, %v1041_v0  ;;  %v884_v27 = vld [vmem:[#allocation5 + $0x20] ss:$8 sps:$4 sm:$0xff]   ;;  %v885_v28 = vld [vmem:[#allocation5 + $0x34] ss:$8 sps:$4 sm:$0xff]   ;;  %v887_v29 = vld [vmem:[#allocation5 + $0x30] ss:$8 sps:$4 sm:$0xff]  }
  0x3f   :  { %265 = vmatprep.subr.bf16.mxu0 %v866_v5  ;;  %515 = vmatpush1.bf16.msra.mxu1 %v878_v23  ;;  %v888_v30 = vld [vmem:[#allocation5 + $0x44] ss:$8 sps:$4 sm:$0xff]   ;;  %v890_v31 = vld [vmem:[#allocation5 + $0x40] ss:$8 sps:$4 sm:$0xff]   ;;  %v891_v32 = vld [vmem:[#allocation5 + $0x54] ss:$8 sps:$4 sm:$0xff]  }
  0x40   :  { %516 = vmatprep.subr.bf16.mxu1 %v879_v24  ;;  %v893_v33 = vld [vmem:[#allocation5 + $0x50] ss:$8 sps:$4 sm:$0xff]   ;;  %v894_v34 = vld [vmem:[#allocation5 + $0x64] ss:$8 sps:$4 sm:$0xff]   ;;  %v896_v35 = vld [vmem:[#allocation5 + $0x60] ss:$8 sps:$4 sm:$0xff]  }
  0x41   :  { %v897_v36 = vld [vmem:[#allocation5 + $0x74] ss:$8 sps:$4 sm:$0xff]   ;;  %v899_v37 = vld [vmem:[#allocation5 + $0x70] ss:$8 sps:$4 sm:$0xff]   ;;  %v900_v38 = vld [vmem:[#allocation5 + $0x84] ss:$8 sps:$4 sm:$0xff]  }
  0x42   :  { %v902_v39 = vld [vmem:[#allocation5 + $0x80] ss:$8 sps:$4 sm:$0xff]   ;;  %v903_v40 = vld [vmem:[#allocation5 + $0x94] ss:$8 sps:$4 sm:$0xff]   ;;  %v905_v41 = vld [vmem:[#allocation5 + $0x90] ss:$8 sps:$4 sm:$0xff]  }
  0x43   :  { %517 = vmatpush1.bf16.msra.mxu1 %v881_v25  ;;  %v906_v42 = vld [vmem:[#allocation5 + $0xa4] ss:$8 sps:$4 sm:$0xff]   ;;  %v908_v43 = vld [vmem:[#allocation5 + $0xa0] ss:$8 sps:$4 sm:$0xff]   ;;  %v909_v44 = vld [vmem:[#allocation5 + $0xb4] ss:$8 sps:$4 sm:$0xff]  }
  0x44   :  { %518 = vmatprep.subr.bf16.mxu1 %v882_v26  ;;  %v911_v45 = vld [vmem:[#allocation5 + $0xb0] ss:$8 sps:$4 sm:$0xff]   ;;  %v912_v46 = vld [vmem:[#allocation5 + $0xc4] ss:$8 sps:$4 sm:$0xff]   ;;  %v914_v47 = vld [vmem:[#allocation5 + $0xc0] ss:$8 sps:$4 sm:$0xff]  }
  0x45   :  { %v915_v48 = vld [vmem:[#allocation5 + $0xd4] ss:$8 sps:$4 sm:$0xff]   ;;  %v917_v49 = vld [vmem:[#allocation5 + $0xd0] ss:$8 sps:$4 sm:$0xff]   ;;  %vm261_vm4 = vcmask 523264   ;;  %v924_v62 = vld [vmem:[#allocation7 + $0x40] sm:$0xff]  }
  0x46   :  { %v753_v50 = vld [vmem:[%s1188_s4] ss:$0 sm:$0xff]  ;;  %v918_v58 = vld [vmem:[#allocation5 + $0xe4] ss:$8 sps:$4 sm:$0xff]   ;;  %v920_v59 = vld [vmem:[#allocation5 + $0xe0] ss:$8 sps:$4 sm:$0xff]  }
  0x47   :  { %519 = vmatpush1.bf16.msra.mxu1 %v884_v27  ;;  %v921_v60 = vld [vmem:[#allocation5 + $0xf4] ss:$8 sps:$4 sm:$0xff]   ;;  %v923_v61 = vld [vmem:[#allocation5 + $0xf0] ss:$8 sps:$4 sm:$0xff]   ;;  %v925_v63 = vld [vmem:[#allocation7] sm:$0xff]  }
  0x48   :  { %520 = vmatprep.subr.bf16.mxu1 %v885_v28  ;;  %v926_v0 = vld [vmem:[#allocation7 + $0x48] sm:$0xff]   ;;  %v928_v2 = vld [vmem:[#allocation7 + $0x50] sm:$0xff]   ;;  %v930_v4 = vld [vmem:[#allocation7 + $0x58] sm:$0xff]  }
  0x49   :  { %v927_v1 = vld [vmem:[#allocation7 + $0x8] sm:$0xff]   ;;  %v929_v3 = vld [vmem:[#allocation7 + $0x10] sm:$0xff]   ;;  %v931_v5 = vld [vmem:[#allocation7 + $0x18] sm:$0xff]  }
  0x4a   :  { %v936_v27 = vld [vmem:[#allocation7 + $0x70] sm:$0xff]  }
  0x4b   :  { %521 = vmatpush1.bf16.msra.mxu1 %v887_v29  ;;  %v937_v28 = vld [vmem:[#allocation7 + $0x30] sm:$0xff]   ;;  %v938_v29 = vld [vmem:[#allocation7 + $0x78] sm:$0xff]  }
  0x4c   :  { %522 = vmatprep.subr.bf16.mxu1 %v888_v30  ;;  %v939_v30 = vld [vmem:[#allocation7 + $0x38] sm:$0xff]  }
  0x4f   :  { %523 = vmatpush1.bf16.msra.mxu1 %v890_v31  ;;  %v342_v31 = vld [vmem:[%s1192_s8] sm:$0x3]  ;;  %s1044_s8 = smov [#allocation8]  }
  0x50   :  { %524 = vmatprep.subr.bf16.mxu1 %v891_v32  ;;  %s741_s26 = sshll.u32 %s1044_s8, 4  ;;  %s742_s26 = int_to_ptr.vmem [resolvable:$true] %s741_s26 }
  0x51   :  { %s1006_s27 = scalar_lea.vmem %s742_s26, 128  ;;  %p1011_p11 = scmp.lt.s32.totalorder %s742_s26, %s742_s26 }
  0x52   :  { %p1007_p10 = scmp.ne.s32.totalorder %s742_s26, %s1006_s27  ;;  %p1012_p12 = scmp.lt.s32.totalorder %s1006_s27, %s1006_s27 }
  0x53   :  { %525 = vmatpush1.bf16.msra.mxu1 %v893_v33 }
  0x54   :  { %526 = vmatprep.subr.bf16.mxu1 %v894_v34  ;;  %p1013_p13 = por %p1012_p12, %p1011_p11 }
  0x56   :  { %p1014_p0 = pnand %p1013_p13, %p1007_p10 }
  0x57   :  { %527 = vmatpush1.bf16.msra.mxu1 %v896_v35 }
  0x58   :  { %528 = vmatprep.subr.bf16.mxu1 %v897_v36 }
  0x5b   :  { %529 = vmatpush1.bf16.msra.mxu1 %v899_v37 }
  0x5c   :  { %530 = vmatprep.subr.bf16.mxu1 %v900_v38 }
  0x5f   :  { %531 = vmatpush1.bf16.msra.mxu1 %v902_v39 }
  0x60   :  { %532 = vmatprep.subr.bf16.mxu1 %v903_v40 }
  0x63   :  { %533 = vmatpush1.bf16.msra.mxu1 %v905_v41 }
  0x64   :  { %534 = vmatprep.subr.bf16.mxu1 %v906_v42 }
  0x67   :  { %535 = vmatpush1.bf16.msra.mxu1 %v908_v43 }
  0x68   :  { %536 = vmatprep.subr.bf16.mxu1 %v909_v44 }
  0x6b   :  { %537 = vmatpush1.bf16.msra.mxu1 %v911_v45  ;;  %v797_v45 = vld [vmem:[%s1194_s10] ss:$0 sm:$0xff] }
  0x6c   :  { %538 = vmatprep.subr.bf16.mxu1 %v912_v46 }
  0x6f   :  { %539 = vmatpush1.bf16.msra.mxu1 %v914_v47 }
  0x70   :  { %540 = vmatprep.subr.bf16.mxu1 %v915_v48 }
  0x73   :  { %541 = vmatpush1.bf16.msra.mxu1 %v917_v49 }
  0x74   :  { %542 = vmatprep.subr.bf16.mxu1 %v918_v58 }
  0x77   :  { %543 = vmatpush1.bf16.msra.mxu1 %v920_v59 }
  0x78   :  { %544 = vmatprep.subr.bf16.mxu1 %v921_v60 }
  0x7b   :  { %545 = vmatpush1.bf16.msra.mxu1 %v923_v61 }
 0x110   :  { %v132_v7 = vpop.f32.mrb[0].mxu0 }
 0x111   :  { %v133_v8 = vadd.f32 %v751_v6, %v132_v7  ;;  %v844_v9 = vpop.f32.mrb[1].mxu0  ;;  %v932_v6 = vld [vmem:[#allocation7 + $0x60] sm:$0xff]  }
 0x112   :  { %v135_v10 = vpop.f32.mrb[2].mxu0  ;;  %v933_v7 = vld [vmem:[#allocation7 + $0x20] sm:$0xff]   ;;  %v935_v9 = vld [vmem:[#allocation7 + $0x28] sm:$0xff]  }
 0x113   :  { %v138_v11 = vmax.f32 %v133_v8, 0.0  ;;  %v845_v12 = vpop.f32.mrb[3].mxu0  ;;  %v934_v8 = vld [vmem:[#allocation7 + $0x68] sm:$0xff]   ;;  %v211_v10 = vlaneseq }
 0x115   :  { %v139_v14 = vpack.c.bf16 %v138_v11, %v138_v11  ;;  %v212_v11 = vshrl.u32 %v211_v10, 7 }
 0x117   :  { %849 = vmatmul.mubr.msk.bf16.vlgmr.msra.gmra.mrb[4].mxu0 %vm155_vm3, %v139_v14  ;;  %v213_v12 = vsub.s32 0, %v212_v11  ;;  %v217_v14 = vsub.s32 1, %v212_v11 }
 0x118   :  { %266 = vmatpush1.bf16.msra.mxu0 %v864_v13  ;;  %297 = vmatprep.mubr.bf16.mxu0 %v1043_v21  ;;  %v209_v13 = vld [vmem:[%s1190_s6] sm:$0x3] }
 0x119   :  { %267 = vmatprep.subr.bf16.mxu0 %v869_v15  ;;  %v214_v15 = vrot.slane %v209_v13, %v213_v12  ;;  %v347_v32 = vrot.slane %v342_v31, %v213_v12  ;;  %v351_v33 = vrot.slane %v342_v31, %v217_v14 }
 0x11c   :  { %268 = vmatpush1.bf16.msra.mxu0 %v867_v16  ;;  %v218_v16 = vrot.slane %v209_v13, %v217_v14 }
 0x11d   :  { %269 = vmatprep.subr.bf16.mxu0 %v872_v17 }
 0x120   :  { %270 = vmatpush1.bf16.msra.mxu0 %v870_v18 }
 0x121   :  { %271 = vmatprep.subr.bf16.mxu0 %v875_v19 }
 0x124   :  { %272 = vmatpush1.bf16.msra.mxu0 %v873_v20 }
 0x125   :  { %818 = vmatprep.subr.bf16.mxu0 %v924_v62 }
 0x1ea   :  { %v193_v51 = vpop.f32.mrb[4].mxu0 }
 0x1eb   :  { %v194_v52 = vadd.f32 %v753_v50, %v193_v51  ;;  %v850_v53 = vpop.f32.mrb[5].mxu0 }
 0x1ec   :  { %v196_v54 = vpop.f32.mrb[6].mxu0 }
 0x1ed   :  { %v199_v55 = vmax.f32 %v194_v52, 0.0  ;;  %v851_v56 = vpop.f32.mrb[7].mxu0 }
 0x1ef   :  { %v200_v57 = vpack.c.bf16 %v199_v55, %v199_v55 }
 0x1f1   :  { %764 = vmatmul.mubr.msk.bf16.vlgmr.msra.gmra.mrb[8].mxu0 %vm261_vm4, %v200_v57 }
 0x1f2   :  { %819 = vmatpush3.bf16.msra.mxu0 %v925_v63 }
 0x1f3   :  { %820 = vmatprep.subr.bf16.mxu0 %v926_v0 }
 0x1f6   :  { %821 = vmatpush3.bf16.msra.mxu0 %v927_v1 }
 0x1f7   :  { %822 = vmatprep.subr.bf16.mxu0 %v928_v2 }
 0x1fa   :  { %823 = vmatpush3.bf16.msra.mxu0 %v929_v3 }
 0x1fb   :  { %824 = vmatprep.subr.bf16.mxu0 %v930_v4 }
 0x1fe   :  { %825 = vmatpush3.bf16.msra.mxu0 %v931_v5 }
 0x1ff   :  { %826 = vmatprep.subr.bf16.mxu0 %v932_v6 }
 0x202   :  { %827 = vmatpush3.bf16.msra.mxu0 %v933_v7 }
 0x203   :  { %828 = vmatprep.subr.bf16.mxu0 %v934_v8 }
 0x206   :  { %829 = vmatpush3.bf16.msra.mxu0 %v935_v9 }
 0x207   :  { %830 = vmatprep.subr.bf16.mxu0 %v936_v27 }
 0x20a   :  { %831 = vmatpush3.bf16.msra.mxu0 %v937_v28 }
 0x20b   :  { %832 = vmatprep.subr.bf16.mxu0 %v938_v29 }
 0x20e   :  { %833 = vmatpush3.bf16.msra.mxu0 %v939_v30 }
 0x2c4   :  { %v299_v17 = vpop.f32.mrb[8].mxu0 }
 0x2c5   :  { %v300_v18 = vadd.f32 %v299_v17, %v214_v15  ;;  %v301_v19 = vpop.f32.mrb[9].mxu0 }
 0x2c6   :  { %v302_v20 = vadd.f32 %v301_v19, %v218_v16  ;;  %v303_v21 = vpop.f32.mrb[10].mxu0 }
 0x2c7   :  { %v306_v22 = vmax.f32 %v300_v18, 0.0  ;;  %v304_v23 = vpop.f32.mrb[11].mxu0 }
 0x2c8   :  { %v307_v24 = vmax.f32 %v302_v20, 0.0 }
 0x2c9   :  { %v308_v26 = vpack.c.bf16 %v306_v22, %v306_v22 }
 0x2ca   :  { %v309_v25 = vpack.c.bf16 %v307_v24, %v307_v24 }
 0x2cc   :  { %546 = vmatprep.mubr.bf16.mxu1 %v309_v25 }
 0x2cd   :  { %547 = vmatmul.mubr.bf16.vlgmr.msra.gmra.mrb[0].mxu1 %v308_v26 }
 0x3a0   :  { %v548_v34 = vpop.f32.mrb[0].mxu1 }
 0x3a1   :  { %v549_v35 = vadd.f32 %v548_v34, %v347_v32  ;;  %v550_v36 = vpop.f32.mrb[1].mxu1 }
 0x3a2   :  { %v551_v37 = vadd.f32 %v550_v36, %v351_v33  ;;  %v552_v38 = vpop.f32.mrb[2].mxu1 }
 0x3a3   :  { %v555_v39 = vmax.f32 %v549_v35, 0.0  ;;  %v553_v40 = vpop.f32.mrb[3].mxu1 }
 0x3a4   :  { %v556_v41 = vmax.f32 %v551_v37, 0.0 }
 0x3a5   :  { %v557_v43 = vpack.c.bf16 %v555_v39, %v555_v39 }
 0x3a6   :  { %v558_v42 = vpack.c.bf16 %v556_v41, %v556_v41 }
 0x3a8   :  { %726 = vmatprep.mubr.bf16.mxu0 %v558_v42 }
 0x3a9   :  { %727 = vmatmul.mubr.bf16.vlgmr.msra.gmra.mrb[12].mxu0 %v557_v43 }
 0x47c   :  { %v834_v44 = vpop.f32.mrb[12].mxu0 }
 0x47d   :  { %v835_v46 = vpop.f32.mrb[13].mxu0 }
 0x47e   :  { %v836_v47 = vadd.f32 %v835_v46, %v834_v44  ;;  %v837_v48 = vpop.f32.mrb[14].mxu0 }
 0x47f   :  { %v838_v49 = vpop.f32.mrb[15].mxu0 }
 0x480   :  { %v729_v50 = vadd.f32 %v836_v47, %v797_v45 }
 0x482   :  { %734 = vst [vmem:[#allocation8] sm:$0xff] %v729_v50 }
 0x483   :  { %1017 = shalt.err (!%p1014_p0)
}
 0x484   :  { %s1018_s10 = scalar_lea.hbm %s1195_s11, 128 }
 0x485   :  { %p1019_p1 = scmp.ne.s32.totalorder %s1195_s11, %s1018_s10  ;;  %p1022_p2 = scmp.lt.u32.totalorder %s1018_s10, %s1195_s11 }
 0x487   :  { %p1024_p3 = pnand %p1022_p2, %p1019_p1 }
 0x489   :  { %1027 = shalt.err (!%p1024_p3)
}
 0x48a   :  { %744 = dma.vmem_to_hbm [thread:$0]  %s742_s26, 128, %s1195_s11, [#allocation4]  }
 0x48b   :  { %1032 = dma.done.wait [#allocation4], 128  }
 0x48c   :  { %1033 = vsyncadd [#allocation4], 4294967168 }
 0x48d   :  { %748 = vsyncpa [#allocation3], 1 }
 0x48e   :  { %749 = vsyncpa [#allocation6], 1 }
 0x48f   :  { %750 = vsyncpa [#allocation4], 1 }

</bundles_post_ra>
